<compile_context>
chip_gen: v7x
topology: tpu7x:2x2x1
jax: 0.10.0
libtpu: 0.0.40
codegen_flags: <defaults>
</compile_context>

<pallas_src>
import functools
import math

import jax
import jax.numpy as jnp
from jax.experimental import pallas as pl
from jax.experimental.pallas import tpu as pltpu


def _attention_head_kernel(hq_ref, hkv_ref, w_ref, b_ref, o_ref,
                           q_ref, acc_ref, *, head_dim, hp, mxu_dtype):
    """One (batch-tile, key-tile) grid step.

    hq_ref:  (bt, S,  E)  activations, query side (constant along the k axis)
    hkv_ref: (bt, sk, E)  activations for this key/value tile
    w_ref:   (E, 3*Hp)    fused [Wq | Wk | Wv], zero-padded to Hp lanes
    b_ref:   (1, 3*Hp)    fused [bq | bk | bv], zero-padded
    o_ref:   (bt, S, H)   output (written only on the last key tile)
    q_ref:   (bt, S, Hp)  f32 scratch: pre-scaled Q, computed once per batch tile
    acc_ref: (bt, S, Hp)  f32 scratch: accumulator over key tiles
    """
    k_idx = pl.program_id(1)
    prec = jax.lax.Precision.HIGHEST

    @pl.when(k_idx == 0)
    def _init():
        hq = hq_ref[...].astype(mxu_dtype)
        wq = w_ref[:, :hp].astype(mxu_dtype)
        q = jax.lax.dot_general(hq, wq, (((2,), (0,)), ((), ())),
                                preferred_element_type=jnp.float32,
                                precision=prec)
        q = q + b_ref[:, :hp]
        # Fold the 1/sqrt(head_dim) scale into Q once (instead of per score).
        q_ref[...] = q * (1.0 / math.sqrt(head_dim))
        acc_ref[...] = jnp.zeros_like(acc_ref)

    # Fused K/V projection for this key tile: one lane-dense (E, 2*Hp) matmul.
    hkv = hkv_ref[...].astype(mxu_dtype)
    wkv = w_ref[:, hp:].astype(mxu_dtype)
    kv = jax.lax.dot_general(hkv, wkv, (((2,), (0,)), ((), ())),
                             preferred_element_type=jnp.float32,
                             precision=prec)
    kv = kv + b_ref[:, hp:]
    k_t = kv[:, :, :hp]
    v_t = kv[:, :, hp:]        # zero in the padded columns >= head_dim

    # Q . K^T as an NT batched dot_general (no explicit transpose / XLU work).
    scores = jax.lax.dot_general(
        q_ref[...].astype(mxu_dtype), k_t.astype(mxu_dtype),
        (((2,), (2,)), ((0,), (0,))),
        preferred_element_type=jnp.float32, precision=prec)    # (bt, Sq, sk)

    # PyTorch reference: F.softmax(scores, dim=1) -> normalize over the QUERY
    # axis.  Key columns are independent, so key tiles need no online rescale.
    m = jnp.max(scores, axis=1, keepdims=True)
    e = jnp.exp(scores - m)
    denom = jnp.sum(e, axis=1, keepdims=True)
    wts = e / denom            # exact divide: approx reciprocal broke 1e-4 tol

    acc_ref[...] += jax.lax.dot_general(
        wts.astype(mxu_dtype), v_t.astype(mxu_dtype),
        (((2,), (1,)), ((0,), (0,))),
        preferred_element_type=jnp.float32, precision=prec)    # (bt, Sq, Hp)

    @pl.when(k_idx == pl.num_programs(1) - 1)
    def _store():
        # Store only the real H columns (single masked store per batch tile)
        # instead of an 8x-padded HBM writeback plus a separate XLA slice.
        o_ref[...] = acc_ref[...][:, :, :head_dim].astype(o_ref.dtype)

    # TODO(synk): optional attention mask (masked_fill) not implemented -- the
    # module default is mask=None.


def attention_head(h, wq, bq, wk, bk, wv, bv, *,
                   block_b=None, block_k=None, mxu_dtype=jnp.float32):
    """h: (B, S, E) f32; w*: (E, H) (pre-transposed Linear weight); b*: (H,).

    Returns (B, S, H), matching the PyTorch AttentionHead forward (softmax
    over dim=1).  Set mxu_dtype=jnp.bfloat16 on v6e/v7x for native-rate MXU
    operands (f32 accumulation and f32 softmax are kept).
    """
    B, S, E = h.shape
    H = wq.shape[1]

    # Pad head dim to one lane-dense 128 tile and fuse QKV weights / biases.
    Hp = max(128, pl.cdiv(H, 128) * 128)
    pad = Hp - H
    w_qkv = jnp.concatenate(
        [jnp.pad(wq, ((0, 0), (0, pad))),
         jnp.pad(wk, ((0, 0), (0, pad))),
         jnp.pad(wv, ((0, 0), (0, pad)))], axis=1)                  # (E, 3*Hp)
    b_qkv = jnp.concatenate(
        [jnp.pad(bq, (0, pad)),
         jnp.pad(bk, (0, pad)),
         jnp.pad(bv, (0, pad))]).reshape(1, 3 * Hp)                 # (1, 3*Hp)

    # --- batch tile: aim for bt*S ~ 256 rows (MXU row width on v6e/v7x). ---
    if block_b is None:
        block_b = max(1, pl.cdiv(256, S))
    bt = max(1, min(block_b, B))
    # Keep >= 2 steps on the parallel axis for v7x megacore when splitting
    # does not drop the per-step row count below one 128-row MXU pass.
    if B < 2 * bt and B >= 2 and (B // 2) * S >= 128:
        bt = B // 2
    nb = pl.cdiv(B, bt)
    B_pad = nb * bt
    h_in = jnp.pad(h, ((0, B_pad - B), (0, 0), (0, 0))) if B_pad != B else h

    # --- key tile: tile Sk (query-axis softmax => key tiles independent). ---
    if block_k is None:
        block_k = 512
    sk = S
    if S > block_k:
        for cand in range(block_k - block_k % 8, 7, -8):    # multiples of 8
            if S % cand == 0:
                sk = cand
                break
        # else: fall back to a monolithic key axis (sk = S)
    nk = S // sk

    # Rough VMEM budget (bytes); raise the scoped limit only when needed
    # (cap at 64 MiB so the same choice is valid on v7x).
    est = 4 * (2 * bt * S * E + 2 * bt * sk * E + 2 * E * 3 * Hp
               + 2 * bt * S * H + 2 * bt * S * Hp
               + bt * sk * 2 * Hp + 3 * bt * S * sk)
    vmem_limit = (min(64 * 1024 * 1024, int(1.5 * est))
                  if est > 12 * 1024 * 1024 else None)

    kernel = functools.partial(_attention_head_kernel,
                               head_dim=H, hp=Hp, mxu_dtype=mxu_dtype)

    out = pl.pallas_call(
        kernel,
        out_shape=jax.ShapeDtypeStruct((B_pad, S, H), h.dtype),
        grid_spec=pltpu.PrefetchScalarGridSpec(
            num_scalar_prefetch=0,
            grid=(nb, nk),
            in_specs=[
                pl.BlockSpec((bt, S, E), lambda b, k: (b, 0, 0)),   # h (queries)
                pl.BlockSpec((bt, sk, E), lambda b, k: (b, k, 0)),  # h (key tile)
                pl.BlockSpec((E, 3 * Hp), lambda b, k: (0, 0)),     # fused W
                pl.BlockSpec((1, 3 * Hp), lambda b, k: (0, 0)),     # fused bias
            ],
            out_specs=pl.BlockSpec((bt, S, H), lambda b, k: (b, 0, 0)),
            scratch_shapes=[pltpu.VMEM((bt, S, Hp), jnp.float32),   # scaled Q
                            pltpu.VMEM((bt, S, Hp), jnp.float32)],  # accumulator
        ),
        compiler_params=pltpu.CompilerParams(
            dimension_semantics=("parallel", "arbitrary"),
            vmem_limit_bytes=vmem_limit),
    )(h_in, h_in, w_qkv, b_qkv)

    return out if B_pad == B else out[:B]


def _reference(h, wq, bq, wk, bk, wv, bv):
    prec = jax.lax.Precision.HIGHEST
    q = jnp.einsum("bse,eh->bsh", h, wq, precision=prec) + bq
    k = jnp.einsum("bse,eh->bsh", h, wk, precision=prec) + bk
    v = jnp.einsum("bse,eh->bsh", h, wv, precision=prec) + bv
    scores = jnp.einsum("bqd,bkd->bqk", q, k,
                        precision=prec) / math.sqrt(q.shape[-1])
    w = jax.nn.softmax(scores, axis=1)      # dim=1, matching the PyTorch code
    return jnp.einsum("bqk,bkd->bqd", w, v, precision=prec)


if __name__ == "__main__":
    B, S, E, H = 2, 8, 32, 16

    key = jax.random.PRNGKey(0)
    k_h, k_wq, k_bq, k_wk, k_bk, k_wv, k_bv = jax.random.split(key, 7)

    h = jax.random.normal(k_h, (B, S, E), dtype=jnp.float32)

    # Deterministic Linear params; stored as (in, out) = (E, H) (pre-transposed).
    bound = 1.0 / math.sqrt(E)
    wq = jax.random.uniform(k_wq, (E, H), jnp.float32, -bound, bound)
    bq = jax.random.uniform(k_bq, (H,), jnp.float32, -bound, bound)
    wk = jax.random.uniform(k_wk, (E, H), jnp.float32, -bound, bound)
    bk = jax.random.uniform(k_bk, (H,), jnp.float32, -bound, bound)
    wv = jax.random.uniform(k_wv, (E, H), jnp.float32, -bound, bound)
    bv = jax.random.uniform(k_bv, (H,), jnp.float32, -bound, bound)

    out = attention_head(h, wq, bq, wk, bk, wv, bv)
    out = jax.block_until_ready(out)

    ref = _reference(h, wq, bq, wk, bk, wv, bv)
    assert out.shape == (B, S, H)
    # Small slack for f32 MXU multi-pass vs XLA HIGHEST-precision reference.
    assert jnp.allclose(out, ref, atol=5e-4, rtol=5e-4), "mismatch vs JAX reference"

    print("KERNEL_OK")
</pallas_src>

<mosaic_0001>
module attributes {stable_mosaic.version = 11 : i64} {
  func.func @_attention_head_kernel(%arg0: i32, %arg1: i32, %arg2: memref<2x8x32xf32, #tpu.memory_space<vmem>>, %arg3: memref<2x8x32xf32, #tpu.memory_space<vmem>>, %arg4: memref<32x384xf32, #tpu.memory_space<vmem>>, %arg5: memref<1x384xf32, #tpu.memory_space<vmem>>, %arg6: memref<2x8x16xf32, #tpu.memory_space<vmem>>, %arg7: memref<2x8x128xf32, #tpu.memory_space<vmem>>, %arg8: memref<2x8x128xf32, #tpu.memory_space<vmem>>) attributes {dimension_semantics = [#tpu.dimension_semantics<parallel>, #tpu.dimension_semantics<arbitrary>], iteration_bounds = array<i64: 1, 1>, scalar_prefetch = 0 : i64, scratch_operands = 2 : i64, tpu.core_type = #tpu.core_type<tc>, window_params = [{transform_indices = @transform_0, window_bounds = array<i64: 2, 8, 32>}, {transform_indices = @transform_1, window_bounds = array<i64: 2, 8, 32>}, {pipeline_mode = #tpu.pipeline_mode<synchronous>, transform_indices = @transform_2, window_bounds = array<i64: 32, 384>}, {pipeline_mode = #tpu.pipeline_mode<synchronous>, transform_indices = @transform_3, window_bounds = array<i64: 1, 384>}, {transform_indices = @transform_4, window_bounds = array<i64: 2, 8, 16>}]} {
    %c0_i32 = arith.constant 0 : i32
    %0 = arith.cmpi eq, %arg1, %c0_i32 : i32
    %1 = arith.extui %0 : i1 to i32
    %c0_i32_0 = arith.constant 0 : i32
    %2 = arith.cmpi ne, %1, %c0_i32_0 : i32
    scf.if %2 {
      %c0_21 = arith.constant 0 : index
      %c0_22 = arith.constant 0 : index
      %c0_23 = arith.constant 0 : index
      %30 = vector.load %arg2[%c0_21, %c0_22, %c0_23] : memref<2x8x32xf32, #tpu.memory_space<vmem>>, vector<2x8x32xf32>
      %c0_24 = arith.constant 0 : index
      %c0_25 = arith.constant 0 : index
      %31 = vector.load %arg4[%c0_24, %c0_25] : memref<32x384xf32, #tpu.memory_space<vmem>>, vector<32x128xf32>
      %cst_26 = arith.constant dense<0.000000e+00> : vector<2x8x128xf32>
      %32 = tpu.matmul %30, %31, %cst_26 {dimension_numbers = #tpu.dot_dimension_numbers<[2], [0], [0, 1], [1], [0, 0, 0, 1, 1, 1], [], []>, precision = #tpu.contract_precision<fp32>} : vector<2x8x32xf32>, vector<32x128xf32>, vector<2x8x128xf32> -> vector<2x8x128xf32>
      %c0_27 = arith.constant 0 : index
      %c0_28 = arith.constant 0 : index
      %33 = vector.load %arg5[%c0_27, %c0_28] : memref<1x384xf32, #tpu.memory_space<vmem>>, vector<1x128xf32>
      %34 = vector.shape_cast %33 : vector<1x128xf32> to vector<1x1x128xf32>
      %35 = vector.broadcast %34 : vector<1x1x128xf32> to vector<2x8x128xf32>
      %36 = arith.addf %32, %35 : vector<2x8x128xf32>
      %cst_29 = arith.constant 2.500000e-01 : f32
      %37 = vector.broadcast %cst_29 : f32 to vector<2x8x128xf32>
      %38 = arith.mulf %36, %37 : vector<2x8x128xf32>
      %c0_30 = arith.constant 0 : index
      %c0_31 = arith.constant 0 : index
      %c0_32 = arith.constant 0 : index
      %39 = vector.load %arg7[%c0_30, %c0_31, %c0_32] : memref<2x8x128xf32, #tpu.memory_space<vmem>>, vector<2x8x128xf32>
      tpu.vector_store %arg7[%c0_30, %c0_31, %c0_32], %38 {strides = array<i32>} : memref<2x8x128xf32, #tpu.memory_space<vmem>>, vector<2x8x128xf32>,
      %cst_33 = arith.constant 0.000000e+00 : f32
      %40 = vector.broadcast %cst_33 : f32 to vector<2x8x128xf32>
      %c0_34 = arith.constant 0 : index
      %c0_35 = arith.constant 0 : index
      %c0_36 = arith.constant 0 : index
      %41 = vector.load %arg8[%c0_34, %c0_35, %c0_36] : memref<2x8x128xf32, #tpu.memory_space<vmem>>, vector<2x8x128xf32>
      tpu.vector_store %arg8[%c0_34, %c0_35, %c0_36], %40 {strides = array<i32>} : memref<2x8x128xf32, #tpu.memory_space<vmem>>, vector<2x8x128xf32>,
    } else {
    }
    %c0 = arith.constant 0 : index
    %c0_1 = arith.constant 0 : index
    %c0_2 = arith.constant 0 : index
    %3 = vector.load %arg3[%c0, %c0_1, %c0_2] : memref<2x8x32xf32, #tpu.memory_space<vmem>>, vector<2x8x32xf32>
    %c0_3 = arith.constant 0 : index
    %c128 = arith.constant 128 : index
    %4 = vector.load %arg4[%c0_3, %c128] : memref<32x384xf32, #tpu.memory_space<vmem>>, vector<32x256xf32>
    %cst = arith.constant dense<0.000000e+00> : vector<2x8x256xf32>
    %5 = tpu.matmul %3, %4, %cst {dimension_numbers = #tpu.dot_dimension_numbers<[2], [0], [0, 1], [1], [0, 0, 0, 1, 1, 1], [], []>, precision = #tpu.contract_precision<fp32>} : vector<2x8x32xf32>, vector<32x256xf32>, vector<2x8x256xf32> -> vector<2x8x256xf32>
    %c0_4 = arith.constant 0 : index
    %c128_5 = arith.constant 128 : index
    %6 = vector.load %arg5[%c0_4, %c128_5] : memref<1x384xf32, #tpu.memory_space<vmem>>, vector<1x256xf32>
    %7 = vector.shape_cast %6 : vector<1x256xf32> to vector<1x1x256xf32>
    %8 = vector.broadcast %7 : vector<1x1x256xf32> to vector<2x8x256xf32>
    %9 = arith.addf %5, %8 : vector<2x8x256xf32>
    %10 = vector.extract_strided_slice %9 {offsets = [0, 0, 0], sizes = [2, 8, 128], strides = [1, 1, 1]} : vector<2x8x256xf32> to vector<2x8x128xf32>
    %11 = vector.extract_strided_slice %9 {offsets = [0, 0, 128], sizes = [2, 8, 128], strides = [1, 1, 1]} : vector<2x8x256xf32> to vector<2x8x128xf32>
    %c0_6 = arith.constant 0 : index
    %c0_7 = arith.constant 0 : index
    %c0_8 = arith.constant 0 : index
    %12 = vector.load %arg7[%c0_6, %c0_7, %c0_8] : memref<2x8x128xf32, #tpu.memory_space<vmem>>, vector<2x8x128xf32>
    %cst_9 = arith.constant dense<0.000000e+00> : vector<2x8x8xf32>
    %13 = tpu.matmul %12, %10, %cst_9 {dimension_numbers = #tpu.dot_dimension_numbers<[2], [2], [1], [1], [0, 0, 0, 1, 1, 1], [0], [0]>, precision = #tpu.contract_precision<fp32>} : vector<2x8x128xf32>, vector<2x8x128xf32>, vector<2x8x8xf32> -> vector<2x8x8xf32>
    %cst_10 = arith.constant dense<0xFF800000> : vector<2x8xf32>
    %14 = vector.multi_reduction <maximumf>, %13, %cst_10 [1] : vector<2x8x8xf32> to vector<2x8xf32>
    %15 = vector.shape_cast %14 : vector<2x8xf32> to vector<2x1x8xf32>
    %16 = vector.broadcast %15 : vector<2x1x8xf32> to vector<2x8x8xf32>
    %17 = arith.subf %13, %16 : vector<2x8x8xf32>
    %18 = math.exp %17 : vector<2x8x8xf32>
    %cst_11 = arith.constant dense<0.000000e+00> : vector<2x8xf32>
    %19 = vector.multi_reduction <add>, %18, %cst_11 [1] : vector<2x8x8xf32> to vector<2x8xf32>
    %20 = vector.shape_cast %19 : vector<2x8xf32> to vector<2x1x8xf32>
    %21 = vector.broadcast %20 : vector<2x1x8xf32> to vector<2x8x8xf32>
    %22 = arith.divf %18, %21 : vector<2x8x8xf32>
    %c0_12 = arith.constant 0 : index
    %c0_13 = arith.constant 0 : index
    %c0_14 = arith.constant 0 : index
    %23 = vector.load %arg8[%c0_12, %c0_13, %c0_14] : memref<2x8x128xf32, #tpu.memory_space<vmem>>, vector<2x8x128xf32>
    %cst_15 = arith.constant dense<0.000000e+00> : vector<2x8x128xf32>
    %24 = tpu.matmul %22, %11, %cst_15 {dimension_numbers = #tpu.dot_dimension_numbers<[2], [1], [1], [2], [0, 0, 0, 1, 1, 2], [0], [0]>, precision = #tpu.contract_precision<fp32>} : vector<2x8x8xf32>, vector<2x8x128xf32>, vector<2x8x128xf32> -> vector<2x8x128xf32>
    %25 = arith.addf %23, %24 : vector<2x8x128xf32>
    %c0_16 = arith.constant 0 : index
    %c0_17 = arith.constant 0 : index
    %c0_18 = arith.constant 0 : index
    %26 = vector.load %arg8[%c0_16, %c0_17, %c0_18] : memref<2x8x128xf32, #tpu.memory_space<vmem>>, vector<2x8x128xf32>
    tpu.vector_store %arg8[%c0_16, %c0_17, %c0_18], %25 {strides = array<i32>} : memref<2x8x128xf32, #tpu.memory_space<vmem>>, vector<2x8x128xf32>,
    %c0_i32_19 = arith.constant 0 : i32
    %27 = arith.cmpi eq, %arg1, %c0_i32_19 : i32
    %28 = arith.extui %27 : i1 to i32
    %c0_i32_20 = arith.constant 0 : i32
    %29 = arith.cmpi ne, %28, %c0_i32_20 : i32
    scf.if %29 {
      %c0_21 = arith.constant 0 : index
      %c0_22 = arith.constant 0 : index
      %c0_23 = arith.constant 0 : index
      %30 = vector.load %arg8[%c0_21, %c0_22, %c0_23] : memref<2x8x128xf32, #tpu.memory_space<vmem>>, vector<2x8x128xf32>
      %31 = vector.extract_strided_slice %30 {offsets = [0, 0, 0], sizes = [2, 8, 16], strides = [1, 1, 1]} : vector<2x8x128xf32> to vector<2x8x16xf32>
      %c0_24 = arith.constant 0 : index
      %c0_25 = arith.constant 0 : index
      %c0_26 = arith.constant 0 : index
      %32 = vector.load %arg6[%c0_24, %c0_25, %c0_26] : memref<2x8x16xf32, #tpu.memory_space<vmem>>, vector<2x8x16xf32>
      tpu.vector_store %arg6[%c0_24, %c0_25, %c0_26], %31 {strides = array<i32>} : memref<2x8x16xf32, #tpu.memory_space<vmem>>, vector<2x8x16xf32>,
    } else {
    }
    return
  }
  func.func @transform_0(%arg0: i32, %arg1: i32) -> (i32, i32, i32) {
    %c0_i32 = arith.constant 0 : i32
    %c0_i32_0 = arith.constant 0 : i32
    %c0_i32_1 = arith.constant 0 : i32
    return %arg0, %c0_i32, %c0_i32_0 : i32, i32, i32
  }
  func.func @transform_1(%arg0: i32, %arg1: i32) -> (i32, i32, i32) {
    %c0_i32 = arith.constant 0 : i32
    %c0_i32_0 = arith.constant 0 : i32
    return %arg0, %arg1, %c0_i32 : i32, i32, i32
  }
  func.func @transform_2(%arg0: i32, %arg1: i32) -> (i32, i32) {
    %c0_i32 = arith.constant 0 : i32
    %c0_i32_0 = arith.constant 0 : i32
    %c0_i32_1 = arith.constant 0 : i32
    return %c0_i32, %c0_i32_0 : i32, i32
  }
  func.func @transform_3(%arg0: i32, %arg1: i32) -> (i32, i32) {
    %c0_i32 = arith.constant 0 : i32
    %c0_i32_0 = arith.constant 0 : i32
    %c0_i32_1 = arith.constant 0 : i32
    return %c0_i32, %c0_i32_0 : i32, i32
  }
  func.func @transform_4(%arg0: i32, %arg1: i32) -> (i32, i32, i32) {
    %c0_i32 = arith.constant 0 : i32
    %c0_i32_0 = arith.constant 0 : i32
    %c0_i32_1 = arith.constant 0 : i32
    return %arg0, %c0_i32, %c0_i32_0 : i32, i32, i32
  }
}

</mosaic_0001>

<bundles_post_ra>
// kernel: tpu_custom_call.1
= control target key start
LH: loop header
LB: loop body
LE: loop exit
PB: predicated region body
PF: predicated region fallthrough
CT: control target
= control target key end

     0   :  { %9 = vsyncpa [#allocation5], 0  ;;  %s4116_s0 = inlined_call_operand.hbm [shape: f32[2,8,32], index: 0, kind: input, shape index: {}]   ;;  %s4117_s1 = inlined_call_operand.hbm [shape: f32[2,8,32], index: 1, kind: input, shape index: {}]   ;;  %s4118_s2 = inlined_call_operand.hbm [shape: f32[32,384], index: 2, kind: input, shape index: {}]   ;;  %s4119_s3 = inlined_call_operand.vmem [shape: f32[1,384], index: 3, kind: input, shape index: {}]   ;;  %s4120_s4 = inlined_call_operand.hbm [shape: f32[2,8,16], index: 4, kind: output, shape index: {}]  }
   0x1   :  { %10 = vsyncpa [#allocation8], 0 }
   0x2   :  { %11 = vsyncpa [#allocation6], 0  ;;  %s3656_s15 = smov [#allocation7]   ;;  %s3657_s17 = smov [#allocation4]  }
   0x3   :  { %s29_s16 = sshll.u32 %s3656_s15, 4  ;;  %s17_s18 = sshll.u32 %s3657_s17, 4  ;;  %s30_s16 = int_to_ptr.vmem [resolvable:$true] %s29_s16  ;;  %s3691_s18 = int_to_ptr.vmem [resolvable:$true] %s17_s18 }
   0x4   :  { %s3562_s21 = scalar_lea.hbm %s4117_s1, 256 }
   0x5   :  { %p3563_p0 = scmp.ne.s32.totalorder %s4117_s1, %s3562_s21  ;;  %p3566_p1 = scmp.lt.u32.totalorder %s3562_s21, %s4117_s1 }
   0x7   :  { %p3568_p2 = pnand %p3566_p1, %p3563_p0 }
   0x9   :  { %3571 = shalt.err (!%p3568_p2)
}
   0xa   :  { %s3572_s26 = scalar_lea.vmem %s30_s16, 256  ;;  %p3577_p4 = scmp.lt.s32.totalorder %s30_s16, %s30_s16 }
   0xb   :  { %p3573_p3 = scmp.ne.s32.totalorder %s30_s16, %s3572_s26  ;;  %p3578_p5 = scmp.lt.s32.totalorder %s3572_s26, %s3572_s26 }
   0xd   :  { %p3579_p6 = por %p3578_p5, %p3577_p4 }
   0xf   :  { %p3580_p7 = pnand %p3579_p6, %p3573_p3 }
  0x11   :  { %3583 = shalt.err (!%p3580_p7)
}
  0x12   :  { %s3658_s27 = smov 128   ;;  %s3659_s28 = smov 8  }
  0x13   :  { %35 = dma.hbm_to_vmem [thread:$0]  %s4117_s1, 256, %s30_s16, [#allocation8], %s3658_s27, %s3658_s27, %s3659_s28  }
  0x14   :  { %s3584_s7 = scalar_lea.hbm %s4116_s0, 256 }
  0x15   :  { %p3585_p8 = scmp.ne.s32.totalorder %s4116_s0, %s3584_s7  ;;  %p3588_p9 = scmp.lt.u32.totalorder %s3584_s7, %s4116_s0 }
  0x17   :  { %p3590_p10 = pnand %p3588_p9, %p3585_p8 }
  0x19   :  { %3593 = shalt.err (!%p3590_p10)
}
  0x1a   :  { %s3594_s12 = scalar_lea.vmem %s3691_s18, 256  ;;  %p3599_p12 = scmp.lt.s32.totalorder %s3691_s18, %s3691_s18 }
  0x1b   :  { %p3595_p11 = scmp.ne.s32.totalorder %s3691_s18, %s3594_s12  ;;  %p3600_p13 = scmp.lt.s32.totalorder %s3594_s12, %s3594_s12 }
  0x1d   :  { %p3601_p0 = por %p3600_p13, %p3599_p12 }
  0x1f   :  { %p3602_p1 = pnand %p3601_p0, %p3595_p11 }
  0x21   :  { %3605 = shalt.err (!%p3602_p1)
}
  0x22   :  { %23 = dma.hbm_to_vmem [thread:$0]  %s4116_s0, 256, %s3691_s18, [#allocation5], %s3658_s27, %s3658_s27, %s3659_s28  }
  0x23   :  { %s3660_s14 = smov [#allocation9]   ;;  %s3606_s19 = scalar_lea.hbm %s4118_s2, 1536 }
  0x24   :  { %s41_s15 = sshll.u32 %s3660_s14, 4  ;;  %p3607_p2 = scmp.ne.s32.totalorder %s4118_s2, %s3606_s19  ;;  %s42_s15 = int_to_ptr.vmem [resolvable:$true] %s41_s15 }
  0x25   :  { %p3610_p3 = scmp.lt.u32.totalorder %s3606_s19, %s4118_s2 }
  0x27   :  { %p3612_p4 = pnand %p3610_p3, %p3607_p2 }
  0x29   :  { %3615 = shalt.err (!%p3612_p4)
}
  0x2a   :  { %s3616_s24 = scalar_lea.vmem %s42_s15, 1536  ;;  %p3621_p6 = scmp.lt.s32.totalorder %s42_s15, %s42_s15 }
  0x2b   :  { %p3617_p5 = scmp.ne.s32.totalorder %s42_s15, %s3616_s24  ;;  %p3622_p7 = scmp.lt.s32.totalorder %s3616_s24, %s3616_s24 }
  0x2d   :  { %p3623_p8 = por %p3622_p7, %p3621_p6 }
  0x2f   :  { %p3624_p9 = pnand %p3623_p8, %p3617_p5 }
  0x31   :  { %3627 = shalt.err (!%p3624_p9)
}
  0x32   :  { %s3661_s0 = smov 384   ;;  %s3662_s18 = smov 24  }
  0x33   :  { %47 = dma.hbm_to_vmem [thread:$0]  %s4118_s2, 1536, %s42_s15, [#allocation8], %s3661_s0, %s3661_s0, %s3662_s18  }
  0x34   :  { %3650 = dma.done.wait [#allocation5], 256  }
  0x35   :  { %3651 = vsyncadd [#allocation5], 4294967040 }
  0x36   :  { %3652 = dma.done.wait [#allocation8], 1792  }
  0x37   :  { %3653 = vsyncadd [#allocation8], 4294965504  ;;  %v3663_v0 = vmov 0.0   ;;  %v65_v1 = vld [vmem:[#allocation9] sm:$0xff]  ;;  %v66_v2 = vld [vmem:[#allocation9 + $0x18] sm:$0xff]  ;;  %vm76_vm0 = vcmask 261120  }
  0x38   :  { %718 = vmatprep.mubr.f32.mxu1 %v3663_v0  ;;  %v620_v3 = vld [vmem:[#allocation9 + $0x10] sm:$0xff]  ;;  %v84_v4 = vand.u32 4294901760, %v65_v1  ;;  %v87_v5 = vand.u32 4294901760, %v66_v2  ;;  %v622_v6 = vld [vmem:[#allocation9 + $0x28] sm:$0xff]  ;;  %v621_v9 = vld [vmem:[#allocation9 + $0x20] sm:$0xff]  ;;  %vm3664_vm1 = vmmov 0  }
  0x39   :  { %v646_v7 = vand.u32 4294901760, %v620_v3  ;;  %v619_v8 = vld [vmem:[#allocation9 + $0x8] sm:$0xff]  ;;  %v650_v10 = vand.u32 4294901760, %v622_v6  ;;  %v652_v12 = vand.u32 4294901760, %v621_v9  ;;  %v3741_v13 = vld [vmem:[#allocation9 + $0x30] sm:$0xff]  ;;  %v624_v15 = vld [vmem:[#allocation9 + $0x40] sm:$0xff] }
  0x3a   :  { %v648_v11 = vand.u32 4294901760, %v619_v8  ;;  %v3743_v14 = vld [vmem:[#allocation9 + $0x48] sm:$0xff]  ;;  %v3745_v16 = vpack.c.bf16 %v87_v5, %v84_v4  ;;  %v90_v18 = vand.u32 4294901760, %v3741_v13  ;;  %v626_v20 = vld [vmem:[#allocation9 + $0x58] sm:$0xff]  ;;  %v625_v22 = vld [vmem:[#allocation9 + $0x50] sm:$0xff]  ;;  %v654_v31 = vand.u32 4294901760, %v624_v15 }
  0x3b   :  { %v3747_v17 = vsub.f32 %v620_v3, %v646_v7  ;;  %v93_v19 = vand.u32 4294901760, %v3743_v14  ;;  %v623_v21 = vld [vmem:[#allocation9 + $0x38] sm:$0xff]  ;;  %v3751_v23 = vpack.c.bf16 %v650_v10, %v646_v7  ;;  %v3753_v24 = vsub.f32 %v622_v6, %v650_v10  ;;  %v63_v27 = vld [vmem:[#allocation4] sm:$0xff]  ;;  %v64_v28 = vld [vmem:[#allocation4 + $0x8] sm:$0xff] }
  0x3c   :  { %v3755_v25 = vpack.c.bf16 %v652_v12, %v648_v11  ;;  %v3757_v26 = vsub.f32 %v619_v8, %v648_v11  ;;  %3373 = vmatprep.subr.bf16.mxu0 %v3745_v16  ;;  %v3760_v29 = vsub.f32 %v621_v9, %v652_v12  ;;  %v658_v32 = vand.u32 4294901760, %v626_v20  ;;  %v617_v37 = vld [vmem:[#allocation7] sm:$0xff]  ;;  %v618_v7 = vld [vmem:[#allocation7 + $0x8] sm:$0xff] }
  0x3d   :  { %v3766_v30 = vpack.c.bf16 %v93_v19, %v90_v18  ;;  %3421 = vmatprep.subr.bf16.mxu1 %v3751_v23  ;;  %3375 = vmatpush3.bf16.msra.mxu0 %v3745_v16  ;;  %v656_v33 = vand.u32 4294901760, %v623_v21  ;;  %v660_v34 = vand.u32 4294901760, %v625_v22  ;;  %v78_v35 = vsel %vm76_vm0, %v63_v27, 0 }
  0x3e   :  { %v81_v36 = vsel %vm76_vm0, %v64_v28, 0  ;;  %3423 = vmatpush1.bf16.msra.mxu1 %v3755_v25  ;;  %v3774_v38 = vpack.c.bf16 %v658_v32, %v654_v31  ;;  %v3776_v39 = vsub.f32 %v624_v15, %v654_v31  ;;  %v3778_v40 = vsub.f32 %v626_v20, %v658_v32 }
  0x3f   :  { %3377 = vmatprep.subr.bf16.mxu0 %v3766_v30  ;;  %v3780_v41 = vand.u32 4294901760, %v78_v35  ;;  %v3782_v42 = vpack.c.bf16 %v660_v34, %v656_v33  ;;  %v3784_v43 = vsub.f32 %v623_v21, %v656_v33  ;;  %v3786_v44 = vsub.f32 %v625_v22, %v660_v34 }
  0x40   :  { %v3788_v45 = vand.u32 4294901760, %v81_v36  ;;  %3425 = vmatprep.subr.bf16.mxu1 %v3774_v38  ;;  %v3794_v47 = vsub.f32 %v65_v1, %v84_v4  ;;  %v3796_v48 = vsub.f32 %v66_v2, %v87_v5  ;;  %v641_v49 = vsel %vm76_vm0, %v617_v37, 0 }
  0x41   :  { %v3792_v46 = vsub.f32 %v78_v35, %v3780_v41  ;;  %3379 = vmatpush3.bf16.msra.mxu0 %v3766_v30  ;;  %v3803_v51 = vand.u32 4294901760, %v641_v49  ;;  %v743_v52 = vand.u32 4294901760, %v3747_v17  ;;  %v755_v53 = vand.u32 4294901760, %v3753_v24 }
  0x42   :  { %v3801_v50 = vsub.f32 %v81_v36, %v3788_v45  ;;  %3427 = vmatpush1.bf16.msra.mxu1 %v3782_v42  ;;  %v175_v55 = vand.u32 4294901760, %v3794_v47  ;;  %v182_v56 = vand.u32 4294901760, %v3796_v48  ;;  %v749_v57 = vand.u32 4294901760, %v3757_v26 }
  0x43   :  { %v154_v54 = vand.u32 4294901760, %v3792_v46  ;;  %v3814_v59 = vsub.f32 %v641_v49, %v3803_v51  ;;  %v744_v60 = vsub.f32 %v3747_v17, %v743_v52  ;;  %v756_v61 = vsub.f32 %v3753_v24, %v755_v53 }
  0x44   :  { %v164_v58 = vand.u32 4294901760, %v3801_v50  ;;  %v176_v63 = vsub.f32 %v3794_v47, %v175_v55  ;;  %v183_v1 = vsub.f32 %v3796_v48, %v182_v56  ;;  %v750_v2 = vsub.f32 %v3757_v26, %v749_v57 }
  0x45   :  { %v155_v62 = vsub.f32 %v3792_v46, %v154_v54  ;;  %v721_v4 = vand.u32 4294901760, %v3814_v59  ;;  %v745_v5 = vand.u32 4294901760, %v744_v60  ;;  %v757_v6 = vand.u32 4294901760, %v756_v61 }
  0x46   :  { %v165_v3 = vsub.f32 %v3801_v50, %v164_v58  ;;  %v177_v9 = vand.u32 4294901760, %v176_v63  ;;  %v184_v10 = vand.u32 4294901760, %v183_v1  ;;  %v751_v11 = vand.u32 4294901760, %v750_v2 }
  0x47   :  { %v156_v8 = vand.u32 4294901760, %v155_v62  ;;  %v722_v15 = vsub.f32 %v3814_v59, %v721_v4  ;;  %v3428_v20 = vpack.c.bf16 %v757_v6, %v745_v5  ;;  %v761_v21 = vand.u32 4294901760, %v3760_v29 }
  0x48   :  { %v166_v12 = vand.u32 4294901760, %v165_v3  ;;  %v3380_v22 = vpack.c.bf16 %v184_v10, %v177_v9  ;;  %v3845_v27 = vsub.f32 %v3741_v13, %v90_v18  ;;  %v3850_v28 = vsub.f32 %v3743_v14, %v93_v19 }
  0x49   :  { %3194 = vmatprep.mubr.f32.mxu0 %v156_v8  ;;  %v644_v31 = vsel %vm76_vm0, %v618_v7, 0  ;;  %v723_v32 = vand.u32 4294901760, %v722_v15  ;;  %3429 = vmatprep.subr.bf16.mxu1 %v3428_v20  ;;  %v762_v33 = vsub.f32 %v3760_v29, %v761_v21  ;;  %v767_v35 = vand.u32 4294901760, %v3776_v39 }
  0x4a   :  { %3195 = vmatmul.mubr.f32.vlgmr.msra.gmra.mrb[0].mxu0 %v166_v12  ;;  %v3856_v34 = vand.u32 4294901760, %v644_v31  ;;  %3381 = vmatprep.subr.bf16.mxu0 %v3380_v22  ;;  %v189_v13 = vand.u32 4294901760, %v3845_v27  ;;  %v196_v18 = vand.u32 4294901760, %v3850_v28  ;;  %v779_v14 = vand.u32 4294901760, %v3778_v40 }
  0x4b   :  { %v773_v19 = vand.u32 4294901760, %v3784_v43  ;;  %3205 = vmatprep.mubr.f32.mxu0 %v3780_v41  ;;  %724 = vmatmul.mubr.f32.vlgmr.msra.gmra.mrb[0].mxu1 %v723_v32  ;;  %v763_v36 = vand.u32 4294901760, %v762_v33  ;;  %v768_v49 = vsub.f32 %v3776_v39, %v767_v35  ;;  %v785_v60 = vand.u32 4294901760, %v3786_v44 }
  0x4c   :  { %3383 = vmatpush3.bf16.msra.mxu0 %v3380_v22  ;;  %v3865_v37 = vsub.f32 %v644_v31, %v3856_v34  ;;  %729 = vmatprep.mubr.f32.mxu1 %v3663_v0  ;;  %v190_v61 = vsub.f32 %v3845_v27, %v189_v13  ;;  %v197_v62 = vsub.f32 %v3850_v28, %v196_v18  ;;  %vm2132_vm2 = vcmask 64512  }
  0x4d   :  { %v780_v63 = vsub.f32 %v3778_v40, %v779_v14  ;;  %v774_v1 = vsub.f32 %v3784_v43, %v773_v19  ;;  %v3430_v2 = vpack.c.bf16 %v763_v36, %v751_v11  ;;  %v769_v5 = vand.u32 4294901760, %v768_v49 }
  0x4e   :  { %v732_v3 = vand.u32 4294901760, %v3865_v37  ;;  %v786_v6 = vsub.f32 %v3786_v44, %v785_v60  ;;  %v191_v7 = vand.u32 4294901760, %v190_v61  ;;  %v198_v8 = vand.u32 4294901760, %v197_v62 }
  0x4f   :  { %v781_v9 = vand.u32 4294901760, %v780_v63  ;;  %v775_v10 = vand.u32 4294901760, %v774_v1  ;;  %3431 = vmatpush1.bf16.msra.mxu1 %v3430_v2  ;;  %v3388_v32 = vpack.c.bf16 %v3796_v48, %v3794_v47  ;;  %v3436_v33 = vpack.c.bf16 %v3753_v24, %v3747_v17 }
  0x50   :  { %v733_v12 = vsub.f32 %v3865_v37, %v732_v3  ;;  %v787_v15 = vand.u32 4294901760, %v786_v6  ;;  %v3384_v20 = vpack.c.bf16 %v198_v8, %v191_v7  ;;  %v3438_v36 = vpack.c.bf16 %v3760_v29, %v3757_v26  ;;  %v3988_v29 = vld [vmem:[%s4119_s3 + $0x1] sm:$0x3] }
  0x51   :  { %v3432_v22 = vpack.c.bf16 %v781_v9, %v769_v5  ;;  %v3392_v49 = vpack.c.bf16 %v3850_v28, %v3845_v27  ;;  %v3440_v61 = vpack.c.bf16 %v3778_v40, %v3776_v39  ;;  %v3442_v62 = vpack.c.bf16 %v3786_v44, %v3784_v43 }
  0x52   :  { %v734_v11 = vand.u32 4294901760, %v733_v12  ;;  %v3434_v31 = vpack.c.bf16 %v787_v15, %v775_v10  ;;  %3385 = vmatprep.subr.bf16.mxu0 %v3384_v20  ;;  %v3404_v63 = vpack.c.bf16 %v182_v56, %v175_v55  ;;  %v3452_v1 = vpack.c.bf16 %v755_v53, %v743_v52 }
  0x53   :  { %3433 = vmatprep.subr.bf16.mxu1 %v3432_v22  ;;  %3387 = vmatpush3.bf16.msra.mxu0 %v3384_v20  ;;  %v3454_v47 = vpack.c.bf16 %v761_v21, %v749_v57  ;;  %v3408_v17 = vpack.c.bf16 %v196_v18, %v189_v13  ;;  %v3456_v24 = vpack.c.bf16 %v779_v14, %v767_v35  ;;  %vm3080_vm3 = vcmask 130048  }
  0x54   :  { %735 = vmatmul.mubr.f32.gmra.mrb[2].mxu1 %v734_v11  ;;  %3389 = vmatprep.subr.bf16.mxu0 %v3388_v32  ;;  %v3458_v26 = vpack.c.bf16 %v785_v60, %v773_v19 }
  0x55   :  { %3435 = vmatpush1.bf16.msra.mxu1 %v3434_v31  ;;  %845 = vmatprep.mubr.f32.mxu1 %v3663_v0 }
  0x56   :  { %3437 = vmatprep.subr.bf16.mxu1 %v3436_v33  ;;  %3206 = vmatmul.mubr.f32.vlgmr.msra.gmra.mrb[0].mxu0 %v3788_v45 }
  0x57   :  { %3391 = vmatpush3.bf16.msra.mxu0 %v3388_v32  ;;  %3216 = vmatprep.mubr.f32.mxu0 %v3792_v46 }
  0x58   :  { %847 = vmatmul.mubr.f32.vlgmr.msra.gmra.mrb[0].mxu1 %v3803_v51  ;;  %3393 = vmatprep.subr.bf16.mxu0 %v3392_v49 }
  0x59   :  { %3439 = vmatpush1.bf16.msra.mxu1 %v3438_v36  ;;  %852 = vmatprep.mubr.f32.mxu1 %v3663_v0 }
  0x5a   :  { %3441 = vmatprep.subr.bf16.mxu1 %v3440_v61 }
  0x5b   :  { %3395 = vmatpush3.bf16.msra.mxu0 %v3392_v49 }
  0x5c   :  { %854 = vmatmul.mubr.f32.gmra.mrb[2].mxu1 %v3856_v34  ;;  %3397 = vmatprep.subr.bf16.mxu0 %v3745_v16 }
  0x5d   :  { %3443 = vmatpush1.bf16.msra.mxu1 %v3442_v62  ;;  %940 = vmatprep.mubr.f32.mxu1 %v3663_v0 }
  0x5e   :  { %3445 = vmatprep.subr.bf16.mxu1 %v3751_v23  ;;  %3217 = vmatmul.mubr.f32.vlgmr.msra.gmra.mrb[0].mxu0 %v3801_v50 }
  0x5f   :  { %3399 = vmatpush3.bf16.msra.mxu0 %v3745_v16  ;;  %3227 = vmatprep.mubr.f32.mxu0 %v154_v54 }
  0x60   :  { %943 = vmatmul.mubr.f32.vlgmr.msra.gmra.mrb[0].mxu1 %v3814_v59  ;;  %3401 = vmatprep.subr.bf16.mxu0 %v3766_v30 }
  0x61   :  { %3447 = vmatpush1.bf16.msra.mxu1 %v3755_v25  ;;  %948 = vmatprep.mubr.f32.mxu1 %v3663_v0 }
  0x62   :  { %3449 = vmatprep.subr.bf16.mxu1 %v3774_v38 }
  0x63   :  { %3403 = vmatpush3.bf16.msra.mxu0 %v3766_v30 }
  0x64   :  { %951 = vmatmul.mubr.f32.gmra.mrb[2].mxu1 %v3865_v37  ;;  %3405 = vmatprep.subr.bf16.mxu0 %v3404_v63 }
  0x65   :  { %3451 = vmatpush1.bf16.msra.mxu1 %v3782_v42  ;;  %1029 = vmatprep.mubr.f32.mxu1 %v3663_v0 }
  0x66   :  { %3453 = vmatprep.subr.bf16.mxu1 %v3452_v1  ;;  %3228 = vmatmul.mubr.f32.vlgmr.msra.gmra.mrb[0].mxu0 %v164_v58 }
  0x67   :  { %3407 = vmatpush3.bf16.msra.mxu0 %v3404_v63  ;;  %3238 = vmatprep.mubr.f32.mxu0 %v3780_v41 }
  0x68   :  { %1033 = vmatmul.mubr.f32.vlgmr.msra.gmra.mrb[0].mxu1 %v721_v4  ;;  %3409 = vmatprep.subr.bf16.mxu0 %v3408_v17 }
  0x69   :  { %3455 = vmatpush1.bf16.msra.mxu1 %v3454_v47  ;;  %1038 = vmatprep.mubr.f32.mxu1 %v3663_v0 }
  0x6a   :  { %3457 = vmatprep.subr.bf16.mxu1 %v3456_v24 }
  0x6b   :  { %3411 = vmatpush3.bf16.msra.mxu0 %v3408_v17 }
  0x6c   :  { %1042 = vmatmul.mubr.f32.gmra.mrb[2].mxu1 %v732_v3  ;;  %3413 = vmatprep.subr.bf16.mxu0 %v3745_v16 }
  0x6d   :  { %3459 = vmatpush1.bf16.msra.mxu1 %v3458_v26  ;;  %1136 = vmatprep.mubr.f32.mxu1 %v3663_v0 }
  0x6e   :  { %3461 = vmatprep.subr.bf16.mxu1 %v3751_v23  ;;  %3239 = vmatmul.mubr.f32.vlgmr.msra.gmra.mrb[0].mxu0 %v3788_v45 }
  0x6f   :  { %3415 = vmatpush3.bf16.msra.mxu0 %v3745_v16  ;;  %3249 = vmatprep.mubr.f32.mxu0 %v3780_v41  ;;  %v629_v16 = vlaneseq }
  0x70   :  { %1138 = vmatmul.mubr.f32.vlgmr.msra.gmra.mrb[0].mxu1 %v3803_v51  ;;  %3417 = vmatprep.subr.bf16.mxu0 %v3766_v30 }
  0x71   :  { %3463 = vmatpush1.bf16.msra.mxu1 %v3755_v25  ;;  %1143 = vmatprep.mubr.f32.mxu1 %v3663_v0  ;;  %v3982_v23 = vshrl.u32 %v629_v16, 7 }
  0x72   :  { %3465 = vmatprep.subr.bf16.mxu1 %v3774_v38 }
  0x73   :  { %3419 = vmatpush3.bf16.msra.mxu0 %v3766_v30  ;;  %v631_v25 = vsub.s32 0, %v3982_v23  ;;  %v3101_v30 = vld [vmem:[%s4119_s3] ss:$0 sm:$0xff]  ;;  %v635_v3 = vsub.s32 1, %v3982_v23  ;;  %s3665_s3 = smov [#allocation10]  }
  0x74   :  { %1145 = vmatmul.mubr.f32.gmra.mrb[2].mxu1 %v3856_v34  ;;  %3252 = vmatprep.subr.mxu0 %v3663_v0  ;;  %s3088_s6 = sshll.u32 %s3665_s3, 4  ;;  %s3089_s6 = int_to_ptr.vmem [resolvable:$true] %s3088_s6 }
  0x75   :  { %3467 = vmatpush1.bf16.msra.mxu1 %v3782_v42  ;;  %1223 = vmatprep.mubr.f32.mxu1 %v3663_v0  ;;  %v632_v38 = vrot.slane %v3988_v29, %v631_v25  ;;  %v636_v5 = vrot.slane %v3988_v29, %v635_v3  ;;  %s3628_s7 = scalar_lea.vmem %s3089_s6, 256  ;;  %p3633_p11 = scmp.lt.s32.totalorder %s3089_s6, %s3089_s6 }
  0x76   :  { %3282 = vmatprep.subr.mxu1 %v3663_v0  ;;  %3250 = vmatmul.mubr.f32.vlgmr.msra.gmra.mrb[0].mxu0 %v3788_v45  ;;  %p3629_p10 = scmp.ne.s32.totalorder %s3089_s6, %s3628_s7  ;;  %p3634_p12 = scmp.lt.s32.totalorder %s3628_s7, %s3628_s7 }
  0x77   :  { %3254 = vmatprep.mubr.msk.f32.mxu0 %vm3664_vm1, %v3663_v0 }
  0x78   :  { %1225 = vmatmul.mubr.f32.vlgmr.msra.gmra.mrb[0].mxu1 %v3803_v51  ;;  %p3635_p13 = por %p3634_p12, %p3633_p11 }
  0x79   :  { %1230 = vmatprep.mubr.f32.mxu1 %v3663_v0 }
  0x7a   :  { %p3636_p0 = pnand %p3635_p13, %p3629_p10 }
  0x7c   :  { %1232 = vmatmul.mubr.f32.gmra.mrb[2].mxu1 %v3856_v34 }
  0x7d   :  { %3284 = vmatprep.mubr.msk.f32.mxu1 %vm3664_vm1, %v3663_v0 }
 0x149   :  { %v3251_v39 = vpop.f32.mrb[0].mxu0 }
 0x14a   :  { %v3468_v40 = vadd.f32 %v3251_v39, %v3101_v30  ;;  %v601_v42 = vpop.f32.mrb[1].mxu0 }
 0x14b   :  { %v1226_v41 = vpop.f32.mrb[0].mxu1  ;;  %v3469_v44 = vadd.f32 %v3101_v30, %v601_v42 }
 0x14c   :  { %v3470_v43 = vadd.f32 %v1226_v41, %v632_v38  ;;  %v3994_v45 = vpop.f32.mrb[1].mxu1  ;;  %v612_v46 = vmul.f32 0.25, %v3468_v40 }
 0x14d   :  { %v611_v50 = vmul.f32 0.25, %v3469_v44  ;;  %v3471_v7 = vadd.f32 %v3994_v45, %v636_v5 }
 0x14e   :  { %v3996_v48 = vand.u32 4294901760, %v3470_v43  ;;  %v3998_v51 = vand.u32 4294901760, %v612_v46 }
 0x14f   :  { %v1233_v52 = vpop.f32.mrb[2].mxu1  ;;  %v4001_v54 = vand.u32 4294901760, %v611_v50  ;;  %v4049_v9 = vand.u32 4294901760, %v3471_v7 }
 0x150   :  { %v1318_v53 = vsub.f32 %v3470_v43, %v3996_v48  ;;  %v3472_v55 = vadd.f32 %v1233_v52, %v632_v38  ;;  %v1235_v56 = vpop.f32.mrb[3].mxu1  ;;  %3253 = vmatpush3.xpose.msra.mxu0 %v3996_v48  ;;  %v1753_v57 = vsub.f32 %v612_v46, %v3998_v51 }
 0x151   :  { %3257 = vmatprep.subr.mxu0 %v3663_v0  ;;  %v1307_v59 = vsub.f32 %v611_v50, %v4001_v54  ;;  %v3473_v6 = vadd.f32 %v1235_v56, %v636_v5 }
 0x152   :  { %v1319_v58 = vand.u32 4294901760, %v1318_v53  ;;  %v1687_v4 = vand.u32 4294901760, %v3472_v55  ;;  %v1754_v21 = vand.u32 4294901760, %v1753_v57 }
 0x153   :  { %v1308_v27 = vand.u32 4294901760, %v1307_v59  ;;  %v4047_v8 = vand.u32 4294901760, %v3473_v6 }
 0x154   :  { %v1764_v28 = vsub.f32 %v3472_v55, %v1687_v4  ;;  %3283 = vmatpush3.xpose.msra.mxu1 %v1687_v4  ;;  %v1755_v34 = vsub.f32 %v1753_v57, %v1754_v21  ;;  %v1320_v35 = vsub.f32 %v1318_v53, %v1319_v58 }
 0x155   :  { %3287 = vmatprep.subr.mxu1 %v3663_v0  ;;  %v1309_v13 = vsub.f32 %v1307_v59, %v1308_v27  ;;  %v2703_v56 = vsub.f32 %v3473_v6, %v4047_v8 }
 0x156   :  { %v1765_v18 = vand.u32 4294901760, %v1764_v28  ;;  %v1756_v14 = vand.u32 4294901760, %v1755_v34  ;;  %v1321_v60 = vand.u32 4294901760, %v1320_v35 }
 0x157   :  { %v1310_v37 = vand.u32 4294901760, %v1309_v13 }
 0x158   :  { %v1766_v19 = vsub.f32 %v1764_v28, %v1765_v18  ;;  %3285 = vmatmul.mubr.f32.vlgmr.msra.gmra.mrb[4].mxu1 %v1756_v14 }
 0x159   :  { %3255 = vmatmul.mubr.f32.vlgmr.msra.gmra.mrb[2].mxu0 %v1310_v37  ;;  %3289 = vmatprep.mubr.msk.f32.mxu1 %vm3664_vm1, %v3663_v0 }
 0x15a   :  { %v1767_v2 = vand.u32 4294901760, %v1766_v19  ;;  %3258 = vmatpush3.xpose.msra.mxu0 %v1321_v60  ;;  %3259 = vmatprep.mubr.msk.f32.mxu0 %vm3664_vm1, %v3663_v0 }
 0x15b   :  { %3262 = vmatprep.subr.mxu0 %v3663_v0 }
 0x15c   :  { %3288 = vmatpush3.xpose.msra.mxu1 %v1767_v2 }
 0x15d   :  { %3292 = vmatprep.subr.mxu1 %v3663_v0 }
 0x160   :  { %3290 = vmatmul.mubr.f32.vlgmr.msra.gmra.mrb[4].mxu1 %v3998_v51 }
 0x161   :  { %3293 = vmatpush3.xpose.msra.mxu1 %v1764_v28  ;;  %3260 = vmatmul.mubr.f32.vlgmr.msra.gmra.mrb[2].mxu0 %v4001_v54  ;;  %v2704_v28 = vand.u32 4294901760, %v2703_v56 }
 0x162   :  { %3263 = vmatpush3.xpose.msra.mxu0 %v1318_v53  ;;  %3294 = vmatprep.mubr.msk.f32.mxu1 %vm3664_vm1, %v3663_v0 }
 0x163   :  { %3297 = vmatprep.subr.mxu1 %v3663_v0  ;;  %3264 = vmatprep.mubr.msk.f32.mxu0 %vm3664_vm1, %v3663_v0  ;;  %v2705_v19 = vsub.f32 %v2703_v56, %v2704_v28 }
 0x164   :  { %3267 = vmatprep.subr.mxu0 %v3663_v0 }
 0x165   :  { %v2706_v6 = vand.u32 4294901760, %v2705_v19 }
 0x168   :  { %3295 = vmatmul.mubr.f32.vlgmr.msra.gmra.mrb[4].mxu1 %v1753_v57 }
 0x169   :  { %3298 = vmatpush3.xpose.msra.mxu1 %v1687_v4  ;;  %3265 = vmatmul.mubr.f32.vlgmr.msra.gmra.mrb[2].mxu0 %v1307_v59 }
 0x16a   :  { %3268 = vmatpush3.xpose.msra.mxu0 %v3996_v48  ;;  %3299 = vmatprep.mubr.msk.f32.mxu1 %vm3664_vm1, %v3663_v0 }
 0x16b   :  { %3302 = vmatprep.subr.mxu1 %v3663_v0  ;;  %3269 = vmatprep.mubr.msk.f32.mxu0 %vm3664_vm1, %v3663_v0 }
 0x16c   :  { %3272 = vmatprep.subr.mxu0 %v3663_v0 }
 0x170   :  { %3300 = vmatmul.mubr.f32.vlgmr.msra.gmra.mrb[4].mxu1 %v1754_v21 }
 0x171   :  { %3303 = vmatpush3.xpose.msra.mxu1 %v1765_v18  ;;  %3270 = vmatmul.mubr.f32.vlgmr.msra.gmra.mrb[2].mxu0 %v1308_v27 }
 0x172   :  { %3273 = vmatpush3.xpose.msra.mxu0 %v1319_v58  ;;  %3304 = vmatprep.mubr.msk.f32.mxu1 %vm3664_vm1, %v3663_v0  ;;  %v2254_v58 = vsub.f32 %v3471_v7, %v4049_v9 }
 0x173   :  { %3307 = vmatprep.subr.mxu1 %v3663_v0  ;;  %3274 = vmatprep.mubr.msk.f32.mxu0 %vm3664_vm1, %v3663_v0 }
 0x174   :  { %3277 = vmatprep.subr.mxu0 %v3663_v0  ;;  %v2255_v35 = vand.u32 4294901760, %v2254_v58 }
 0x176   :  { %v2256_v60 = vsub.f32 %v2254_v58, %v2255_v35 }
 0x178   :  { %3305 = vmatmul.mubr.f32.vlgmr.msra.gmra.mrb[4].mxu1 %v3998_v51 }
 0x179   :  { %3308 = vmatpush3.xpose.msra.mxu1 %v1687_v4  ;;  %3275 = vmatmul.mubr.f32.vlgmr.msra.gmra.mrb[2].mxu0 %v4001_v54 }
 0x17a   :  { %3278 = vmatpush3.xpose.msra.mxu0 %v3996_v48  ;;  %3309 = vmatprep.mubr.msk.f32.mxu1 %vm3664_vm1, %v3663_v0 }
 0x17b   :  { %3342 = vmatprep.subr.mxu1 %v3663_v0  ;;  %3279 = vmatprep.mubr.msk.f32.mxu0 %vm3664_vm1, %v3663_v0 }
 0x17c   :  { %3312 = vmatprep.subr.mxu0 %v3663_v0 }
 0x180   :  { %3310 = vmatmul.mubr.f32.vlgmr.msra.gmra.mrb[4].mxu1 %v3998_v51 }
 0x181   :  { %3343 = vmatpush3.msra.mxu1 %v4047_v8  ;;  %3280 = vmatmul.mubr.f32.vlgmr.msra.gmra.mrb[2].mxu0 %v4001_v54 }
 0x182   :  { %3313 = vmatpush3.msra.mxu0 %v4049_v9  ;;  %3344 = vmatprep.mubr.msk.f32.mxu1 %vm3664_vm1, %v3663_v0 }
 0x183   :  { %3347 = vmatprep.subr.mxu1 %v3663_v0  ;;  %3314 = vmatprep.mubr.msk.f32.mxu0 %vm3664_vm1, %v3663_v0 }
 0x184   :  { %3317 = vmatprep.subr.mxu0 %v3663_v0 }
 0x253   :  { %v2128_v10 = vpop.f32.mrb[4].mxu1 }
 0x254   :  { %v2140_v12 = vsel %vm2132_vm2, %v2128_v10, -inf  ;;  %v1682_v15 = vpop.f32.mrb[2].mxu0  ;;  %v3311_v20 = vpop.f32.mrb[5].mxu1 }
 0x255   :  { %v2141_v22 = vrot.slane %v2140_v12, 4  ;;  %v2133_v11 = vsel %vm2132_vm2, %v1682_v15, -inf  ;;  %v3281_v31 = vpop.f32.mrb[3].mxu0 }
 0x256   :  { %v2134_v32 = vrot.slane %v2133_v11, 4 }
 0x257   :  { %v2142_v33 = vmax.f32 %v2140_v12, %v2141_v22 }
 0x258   :  { %v2135_v36 = vmax.f32 %v2133_v11, %v2134_v32 }
 0x259   :  { %v2143_v49 = vrot.slane %v2142_v33, 2 }
 0x25a   :  { %v2136_v61 = vrot.slane %v2135_v36, 2 }
 0x25b   :  { %v2144_v62 = vmax.f32 %v2142_v33, %v2143_v49 }
 0x25c   :  { %v2137_v63 = vmax.f32 %v2135_v36, %v2136_v61 }
 0x25d   :  { %v2145_v1 = vrot.slane %v2144_v62, 1 }
 0x25e   :  { %v2138_v47 = vrot.slane %v2137_v63, 1 }
 0x25f   :  { %v2146_v17 = vmax.f32 %v2144_v62, %v2145_v1 }
 0x260   :  { %v2139_v24 = vmax.f32 %v2137_v63, %v2138_v47 }
 0x261   :  { %v2148_v26 = vsub.f32 %v2128_v10, %v2146_v17  ;;  %v2257_v10 = vand.u32 4294901760, %v2256_v60 }
 0x262   :  { %v2147_v16 = vsub.f32 %v1682_v15, %v2139_v24 }
 0x263   :  { %v2151_v23 = vmul.f32 1.442695, %v2148_v26 }
 0x264   :  { %v2149_v25 = vmul.f32 1.442695, %v2147_v16 }
 0x265   :  { %3554 = vpow2.f32 %v2151_v23 }
 0x266   :  { %3556 = vpow2.f32 %v2149_v25 }
 0x26f   :  { %v3555_v29 = vpop.eup %3554 }
 0x270   :  { %v3557_v30 = vpop.eup %3556  ;;  %v2160_v38 = vsel %vm2132_vm2, %v3555_v29, 0.0 }
 0x271   :  { %v2161_v39 = vrot.slane %v2160_v38, 4  ;;  %v2153_v40 = vsel %vm2132_vm2, %v3557_v30, 0.0 }
 0x272   :  { %v2154_v41 = vrot.slane %v2153_v40, 4 }
 0x273   :  { %v2162_v42 = vadd.f32 %v2161_v39, %v2160_v38 }
 0x274   :  { %v2155_v43 = vadd.f32 %v2154_v41, %v2153_v40 }
 0x275   :  { %v2163_v44 = vrot.slane %v2162_v42, 2 }
 0x276   :  { %v2156_v45 = vrot.slane %v2155_v43, 2 }
 0x277   :  { %v2164_v46 = vadd.f32 %v2163_v44, %v2162_v42 }
 0x278   :  { %v2157_v48 = vadd.f32 %v2156_v45, %v2155_v43 }
 0x279   :  { %v2165_v50 = vrot.slane %v2164_v46, 1 }
 0x27a   :  { %v2158_v51 = vrot.slane %v2157_v48, 1 }
 0x27b   :  { %v2166_v52 = vadd.f32 %v2165_v50, %v2164_v46 }
 0x27c   :  { %v2159_v53 = vadd.f32 %v2158_v51, %v2157_v48 }
 0x27d   :  { %3558 = vrcp.f32 %v2166_v52 }
 0x27e   :  { %3560 = vrcp.f32 %v2159_v53 }
 0x287   :  { %v3559_v54 = vpop.eup %3558 }
 0x288   :  { %v3561_v55 = vpop.eup %3560  ;;  %v2170_v57 = vmul.f32 %v3559_v54, %v3555_v29 }
 0x289   :  { %v2168_v59 = vmul.f32 %v3561_v55, %v3557_v30 }
 0x28a   :  { %v2623_v4 = vsel %vm2132_vm2, %v2170_v57, 0 }
 0x28b   :  { %v2691_v21 = vand.u32 4294901760, %v2623_v4  ;;  %v2174_v27 = vsel %vm2132_vm2, %v2168_v59, 0 }
 0x28c   :  { %v2242_v34 = vand.u32 4294901760, %v2174_v27 }
 0x28d   :  { %v2692_v13 = vsub.f32 %v2623_v4, %v2691_v21 }
 0x28e   :  { %v2243_v18 = vsub.f32 %v2174_v27, %v2242_v34 }
 0x28f   :  { %v2693_v14 = vand.u32 4294901760, %v2692_v13 }
 0x290   :  { %v2244_v37 = vand.u32 4294901760, %v2243_v18 }
 0x291   :  { %v2694_v2 = vsub.f32 %v2692_v13, %v2693_v14 }
 0x292   :  { %v2245_v3 = vsub.f32 %v2243_v18, %v2244_v37 }
 0x293   :  { %v2695_v5 = vand.u32 4294901760, %v2694_v2 }
 0x294   :  { %v2246_v7 = vand.u32 4294901760, %v2245_v3 }
 0x295   :  { %3345 = vmatmul.mubr.f32.vlgmr.msra.gmra.mrb[6].mxu1 %v2695_v5 }
 0x296   :  { %3348 = vmatpush3.msra.mxu1 %v2706_v6  ;;  %3315 = vmatmul.mubr.f32.vlgmr.msra.gmra.mrb[4].mxu0 %v2246_v7 }
 0x297   :  { %3318 = vmatpush3.msra.mxu0 %v2257_v10  ;;  %3349 = vmatprep.mubr.msk.f32.mxu1 %vm3664_vm1, %v3663_v0 }
 0x298   :  { %3352 = vmatprep.subr.mxu1 %v3663_v0  ;;  %3319 = vmatprep.mubr.msk.f32.mxu0 %vm3664_vm1, %v3663_v0 }
 0x299   :  { %3322 = vmatprep.subr.mxu0 %v3663_v0 }
 0x29d   :  { %3350 = vmatmul.mubr.f32.vlgmr.msra.gmra.mrb[6].mxu1 %v2691_v21 }
 0x29e   :  { %3353 = vmatpush3.msra.mxu1 %v2703_v56  ;;  %3320 = vmatmul.mubr.f32.vlgmr.msra.gmra.mrb[4].mxu0 %v2242_v34 }
 0x29f   :  { %3323 = vmatpush3.msra.mxu0 %v2254_v58  ;;  %3354 = vmatprep.mubr.msk.f32.mxu1 %vm3664_vm1, %v3663_v0 }
 0x2a0   :  { %3357 = vmatprep.subr.mxu1 %v3663_v0  ;;  %3324 = vmatprep.mubr.msk.f32.mxu0 %vm3664_vm1, %v3663_v0 }
 0x2a1   :  { %3327 = vmatprep.subr.mxu0 %v3663_v0 }
 0x2a5   :  { %3355 = vmatmul.mubr.f32.vlgmr.msra.gmra.mrb[6].mxu1 %v2692_v13 }
 0x2a6   :  { %3358 = vmatpush3.msra.mxu1 %v4047_v8  ;;  %3325 = vmatmul.mubr.f32.vlgmr.msra.gmra.mrb[4].mxu0 %v2243_v18 }
 0x2a7   :  { %3328 = vmatpush3.msra.mxu0 %v4049_v9  ;;  %3359 = vmatprep.mubr.msk.f32.mxu1 %vm3664_vm1, %v3663_v0 }
 0x2a8   :  { %3362 = vmatprep.subr.mxu1 %v3663_v0  ;;  %3329 = vmatprep.mubr.msk.f32.mxu0 %vm3664_vm1, %v3663_v0 }
 0x2a9   :  { %3332 = vmatprep.subr.mxu0 %v3663_v0 }
 0x2ad   :  { %3360 = vmatmul.mubr.f32.vlgmr.msra.gmra.mrb[6].mxu1 %v2693_v14 }
 0x2ae   :  { %3363 = vmatpush3.msra.mxu1 %v2704_v28  ;;  %3330 = vmatmul.mubr.f32.vlgmr.msra.gmra.mrb[4].mxu0 %v2244_v37 }
 0x2af   :  { %3333 = vmatpush3.msra.mxu0 %v2255_v35  ;;  %3364 = vmatprep.mubr.msk.f32.mxu1 %vm3664_vm1, %v3663_v0 }
 0x2b0   :  { %3367 = vmatprep.subr.mxu1 %v3663_v0  ;;  %3334 = vmatprep.mubr.msk.f32.mxu0 %vm3664_vm1, %v3663_v0 }
 0x2b1   :  { %3337 = vmatprep.subr.mxu0 %v3663_v0 }
 0x2b5   :  { %3365 = vmatmul.mubr.f32.vlgmr.msra.gmra.mrb[6].mxu1 %v2691_v21 }
 0x2b6   :  { %3368 = vmatpush3.msra.mxu1 %v4047_v8  ;;  %3335 = vmatmul.mubr.f32.vlgmr.msra.gmra.mrb[4].mxu0 %v2242_v34 }
 0x2b7   :  { %3338 = vmatpush3.msra.mxu0 %v4049_v9  ;;  %3369 = vmatprep.mubr.msk.f32.mxu1 %vm3664_vm1, %v3663_v0 }
 0x2b8   :  { %3339 = vmatprep.mubr.msk.f32.mxu0 %vm3664_vm1, %v3663_v0 }
 0x2bd   :  { %3370 = vmatmul.mubr.f32.vlgmr.msra.gmra.mrb[6].mxu1 %v2691_v21 }
 0x2be   :  { %3340 = vmatmul.mubr.f32.vlgmr.msra.gmra.mrb[4].mxu0 %v2242_v34 }
 0x390   :  { %v3067_v12 = vpop.f32.mrb[6].mxu1 }
 0x391   :  { %3082 = vst.msk [vmem:[#allocation10 + $0x8] sm:$0xff] %vm3080_vm3, %v3067_v12  ;;  %v2618_v15 = vpop.f32.mrb[4].mxu0  ;;  %v3371_v20 = vpop.f32.mrb[7].mxu1 }
 0x392   :  { %3081 = vst.msk [vmem:[#allocation10] sm:$0xff] %vm3080_vm3, %v2618_v15  ;;  %v3341_v8 = vpop.f32.mrb[5].mxu0 }
 0x393   :  { %3639 = shalt.err (!%p3636_p0)
}
 0x394   :  { %s3640_s10 = scalar_lea.hbm %s4120_s4, 256 }
 0x395   :  { %p3641_p1 = scmp.ne.s32.totalorder %s4120_s4, %s3640_s10  ;;  %p3644_p2 = scmp.lt.u32.totalorder %s3640_s10, %s4120_s4 }
 0x397   :  { %p3646_p3 = pnand %p3644_p2, %p3641_p1 }
 0x399   :  { %3649 = shalt.err (!%p3646_p3)
}
 0x39a   :  { %3094 = dma.vmem_to_hbm [thread:$0]  %s3089_s6, 256, %s4120_s4, [#allocation6], %s3658_s27, %s3658_s27, %s3659_s28  }
 0x39b   :  { %3654 = dma.done.wait [#allocation6], 256  }
 0x39c   :  { %3655 = vsyncadd [#allocation6], 4294967040 }
 0x39d   :  { %3098 = vsyncpa [#allocation5], 1 }
 0x39e   :  { %3099 = vsyncpa [#allocation8], 1 }
 0x39f   :  { %3100 = vsyncpa [#allocation6], 1 }

</bundles_post_ra>
